<compile_context>
chip_gen: v7x
topology: tpu7x:2x2x1
jax: 0.10.0
libtpu: 0.0.40
codegen_flags: <defaults>
</compile_context>

<pallas_src>
import functools

import jax
import jax.numpy as jnp
from jax.experimental import pallas as pl
from jax.experimental.pallas import tpu as pltpu


def _round_up(x, m):
    return ((x + m - 1) // m) * m


def _sector_crop_kernel(x_ref, o_ref, *, roll_amt, band_lo, band_hi, fill):
    """One (tr, L) row tile: lane-roll columns + mask outside band with fill."""
    x = x_ref[...]                                              # (tr, L) in VMEM
    # Output column j inside [band_lo, band_hi) must hold input column
    # j + (left - pad_left); outside the band it is `fill`.  Band columns only
    # ever map into [left, left+crop_w) which lies inside the real input
    # columns [0, H), so partial-block garbage lanes/rows never leak out.
    shifted = pltpu.roll(x, shift=roll_amt, axis=1) if roll_amt else x
    # Narrow iota (1, L) broadcast against the tile — avoids a full-tile iota.
    col = jax.lax.broadcasted_iota(jnp.int32, (1, x.shape[1]), 1)
    keep = (col >= band_lo) & (col < band_hi)
    o_ref[...] = jnp.where(keep, shifted, jnp.asarray(fill, dtype=x.dtype))


def random_sector_crop(img, new_w, fill=0):
    """Pallas implementation of RandomSectorCrop.forward with fixed new_W."""
    C, W, H = img.shape
    dtype = img.dtype
    itemsize = jnp.dtype(dtype).itemsize

    # width_range is (0.5, 1.0] => new_w <= W; larger would make pad_left
    # negative and diverge from TF.pad semantics.
    assert 0 < new_w <= W, f"new_w must be in (0, W]; got new_w={new_w}, W={W}"

    # --- PyTorch forward geometry (all host-side Python ints) ---------------
    center = W // 2
    left = max(center - new_w // 2, 0)
    right = left + new_w
    crop_w = max(0, min(right, H) - left)          # slice clamps like torch
    pad_left = (W - new_w) // 2
    pad_right = W - new_w - pad_left
    out_w = pad_left + crop_w + pad_right          # output last-axis width
    shift = left - pad_left                        # in-band column offset

    # --- lane-dense block layout (no host-side padding) ----------------------
    # Block lane width covers both input (H) and output (out_w), rounded up to
    # a multiple of 128.  The block may overhang either array: input overhang
    # lanes are never selected by the band mask, output overhang lanes are
    # dropped at writeback.
    L = max(H, out_w)
    L_pad = _round_up(max(L, 128), 128)
    roll_amt = (-shift) % L_pad

    # --- collapse channels into rows (free reshape of contiguous dims) -------
    rows = C * W
    x2d = img.reshape(rows, H)

    # --- row tiling: even, balanced tile count under a ~2 MiB/block cap ------
    sub = 8 * max(1, 4 // itemsize)                # sublane pack: 8/16/32 for f32/bf16/u8
    TARGET_BLOCK_BYTES = 2 << 20                   # v7x/v5e-safe, roofline-big
    row_groups = pl.cdiv(rows, sub)
    bytes_per_group = L_pad * itemsize * sub
    max_gpt = max(1, TARGET_BLOCK_BYTES // bytes_per_group)
    n_tiles = pl.cdiv(row_groups, max_gpt)         # min tiles for VMEM budget
    if row_groups >= 2:
        # Prefer an even, near-equal split so v7x's two TensorCores balance
        # (costs at most one ~0.35 us extra grid step on single-TC v5e/v6e).
        n_tiles = max(n_tiles, 2)
        if n_tiles % 2:
            n_tiles += 1
        n_tiles = min(n_tiles, row_groups)
    gpt = pl.cdiv(row_groups, n_tiles)
    n_tiles = pl.cdiv(row_groups, gpt)             # actual tile count
    tr = gpt * sub

    kernel = functools.partial(
        _sector_crop_kernel,
        roll_amt=roll_amt,
        band_lo=pad_left,
        band_hi=pad_left + crop_w,
        fill=fill,
    )

    out2d = pl.pallas_call(
        kernel,
        out_shape=jax.ShapeDtypeStruct((rows, out_w), dtype),
        grid=(n_tiles,),
        in_specs=[pl.BlockSpec((tr, L_pad), lambda r: (r, 0))],
        out_specs=pl.BlockSpec((tr, L_pad), lambda r: (r, 0)),
        compiler_params=pltpu.CompilerParams(dimension_semantics=("parallel",)),
    )(x2d)

    return out2d.reshape(C, W, out_w)


def _reference(img, new_w, fill):
    """Pure-JAX reference of the PyTorch forward pass."""
    C, W, H = img.shape
    left = max(W // 2 - new_w // 2, 0)
    right = left + new_w
    cropped = img[:, :, left:right]
    pad_left = (W - new_w) // 2
    pad_right = W - new_w - pad_left
    return jnp.pad(cropped, ((0, 0), (0, 0), (pad_left, pad_right)),
                   constant_values=fill)


if __name__ == "__main__":
    key = jax.random.PRNGKey(0)
    k_img, k_scale, k_img2 = jax.random.split(key, 3)

    # ---- Test 1: square image (C, W, H), exact 128-lane width ---------------
    C, W, H = 4, 128, 128
    img = jax.random.normal(k_img, (C, W, H), dtype=jnp.float32)
    # Deterministic stand-in for set_deterministic(): scale_w ~ U(0.5, 1.0).
    # (The torch host-side RNG draw is replaced by a jax.random draw here.)
    scale_w = float(jax.random.uniform(k_scale, (), minval=0.5, maxval=1.0))
    new_w = int(W * scale_w)

    out = jax.block_until_ready(random_sector_crop(img, new_w, fill=0.0))
    ref = _reference(img, new_w, 0.0)
    assert out.shape == ref.shape, (out.shape, ref.shape)
    assert bool(jnp.array_equal(out, ref)), "mismatch vs reference (square)"

    # ---- Test 2: non-square image, partial lane blocks, clamped crop --------
    C2, W2, H2 = 2, 160, 96
    img2 = jax.random.normal(k_img2, (C2, W2, H2), dtype=jnp.float32)
    new_w2 = 120                                   # right > H2 -> clamped crop
    out2 = jax.block_until_ready(random_sector_crop(img2, new_w2, fill=0.0))
    ref2 = _reference(img2, new_w2, 0.0)
    assert out2.shape == ref2.shape, (out2.shape, ref2.shape)
    assert bool(jnp.array_equal(out2, ref2)), "mismatch vs reference (clamped)"

    print("KERNEL_OK")
</pallas_src>

<mosaic_0001>
module attributes {stable_mosaic.version = 11 : i64} {
  func.func @_sector_crop_kernel(%arg0: i32, %arg1: memref<256x128xf32, #tpu.memory_space<vmem>>, %arg2: memref<256x128xf32, #tpu.memory_space<vmem>>) attributes {dimension_semantics = [#tpu.dimension_semantics<parallel>], iteration_bounds = array<i64: 2>, scalar_prefetch = 0 : i64, scratch_operands = 0 : i64, tpu.core_type = #tpu.core_type<tc>, window_params = [{transform_indices = @transform_0, window_bounds = array<i64: 256, 128>}, {transform_indices = @transform_1, window_bounds = array<i64: 256, 128>}]} {
    %c0 = arith.constant 0 : index
    %c0_0 = arith.constant 0 : index
    %0 = vector.load %arg1[%c0, %c0_0] : memref<256x128xf32, #tpu.memory_space<vmem>>, vector<256x128xf32>
    %1 = tpu.iota {dimensions = array<i32: 1>} : vector<1x128xi32>
    %c32_i32 = arith.constant 32 : i32
    %2 = vector.broadcast %c32_i32 : i32 to vector<1x128xi32>
    %3 = arith.cmpi sge, %1, %2 : vector<1x128xi32>
    %c96_i32 = arith.constant 96 : i32
    %4 = vector.broadcast %c96_i32 : i32 to vector<1x128xi32>
    %5 = arith.cmpi slt, %1, %4 : vector<1x128xi32>
    %6 = arith.andi %3, %5 : vector<1x128xi1>
    %cst = arith.constant 0.000000e+00 : f32
    %7 = vector.shape_cast %6 : vector<1x128xi1> to vector<1x128xi1>
    %8 = vector.broadcast %7 : vector<1x128xi1> to vector<256x128xi1>
    %9 = vector.broadcast %cst : f32 to vector<256x128xf32>
    %10 = arith.select %8, %0, %9 : vector<256x128xi1>, vector<256x128xf32>
    %c0_1 = arith.constant 0 : index
    %c0_2 = arith.constant 0 : index
    %11 = vector.load %arg2[%c0_1, %c0_2] : memref<256x128xf32, #tpu.memory_space<vmem>>, vector<256x128xf32>
    tpu.vector_store %arg2[%c0_1, %c0_2], %10 {strides = array<i32>} : memref<256x128xf32, #tpu.memory_space<vmem>>, vector<256x128xf32>,
    return
  }
  func.func @transform_0(%arg0: i32) -> (i32, i32) {
    %c0_i32 = arith.constant 0 : i32
    %c0_i32_0 = arith.constant 0 : i32
    return %arg0, %c0_i32 : i32, i32
  }
  func.func @transform_1(%arg0: i32) -> (i32, i32) {
    %c0_i32 = arith.constant 0 : i32
    %c0_i32_0 = arith.constant 0 : i32
    return %arg0, %c0_i32 : i32, i32
  }
}

</mosaic_0001>

<bundles_post_ra>
// kernel: tpu_custom_call.1
= control target key start
LH: loop header
LB: loop body
LE: loop exit
PB: predicated region body
PF: predicated region fallthrough
CT: control target
= control target key end

     0   :  { %6 = vsyncpa [#allocation3], 0  ;;  %s810_s0 = inlined_call_operand.hbm [shape: f32[512,128], index: 0, kind: input, shape index: {}]   ;;  %s811_s1 = inlined_call_operand.hbm [shape: f32[512,128], index: 1, kind: output, shape index: {}]  }
   0x1   :  { %8 = vsyncpa [#allocation3 + $0x1], 0 }
   0x2   :  { %9 = vsyncpa [#allocation4], 0 }
   0x3   :  { %11 = vsyncpa [#allocation4 + $0x1], 0  ;;  %s507_s6 = smov 0   ;;  %s509_s7 = smov 0  }
   0x4   :  { %s511_s8 = smov 0   ;;  %s513_s9 = smov 0  }
   0x5 LB: > { %s528_s10 = sadd.s32 4294967295, %s489_s9   ;;  %s327_s11 = sadd.s32 4294967294, %s489_s9   ;;  %s489_s9 = sphi %s513_s9, %s826_s9   ;;  %s485_s8 = sphi %s511_s8, %s825_s8   ;;  %s481_s7 = sphi %s509_s7, %s824_s7   ;;  %s477_s6 = sphi %s507_s6, %s823_s6  }
   0x6   : > { %s532_s12 = sadd.s32 1, %s489_s9   ;;  %s24_s13 = sadd.s32 1, %s485_s8 }
   0x7   : > { %s21_s14 = ssub.s32 %s489_s9, %s532_s12  ;;  %p31_p0 = scmp.ne.s32.totalorder %s485_s8, %s481_s7 }
   0x8   : > { %p22_p1 = scmp.eq.s32.totalorder %s21_s14, 0  ;;  %p32_p2 = scmp.eq.s32.totalorder %s489_s9, 0 }
   0x9   : > { %p37_p3 = scmp.ne.s32.totalorder %s481_s7, %s477_s6  ;;  %p38_p4 = scmp.eq.s32.totalorder %s528_s10, 0 }
   0xa   : > { %s544_s15 = scalar_select %p22_p1, %s485_s8, %s24_s13  }
   0xb   : > { %p546_p5 = por %p32_p2, %p31_p0  ;;  %p550_p6 = por %p38_p4, %p37_p3 }
   0xc   : > { %p61_p7 = scmp.eq.s32.totalorder %s528_s10, 1  ;;  %p67_p8 = scmp.eq.s32.totalorder %s327_s11, 1 }
   0xd   : > { %p355_p10 = scmp.lt.s32.totalorder %s489_s9, 2  ;;  %s87_s20 = sand.u32 1, %s485_s8  }
   0xe   : > { %p557_p11 = por %p61_p7, %p31_p0  ;;  %p561_p12 = por %p67_p8, %p37_p3 }
   0xf   : > { %s341_s21 = sshll.u32 %s489_s9, 12  ;;  %s330_s22 = sshll.u32 %s87_s20, 8 }
  0x10   : > { %s815_s18 = scalar_select %p557_p11, 1, 0 }
  0x11   : > { %s816_s19 = scalar_select %p561_p12, 1, 0 }
  0x12   : > { %s570_s25 = scalar_lea.hbm %s810_s0, %s341_s21  ;;  %s91_s26 = scalar_lea.vmem [#allocation2], %s330_s22 }
  0x13   : > { %s98_s27 = sshll.u32 %s91_s26, 4  ;;  %p574_p13 = pnand %p355_p10, %p546_p5  ;;  %s578_s27 = int_to_ptr.vmem [resolvable:$true] %s98_s27 }
  0x14   : > { %s580_s29 = scalar_lea.sflag [#allocation3], %s87_s20  ;;  %s393_s30 = scalar_lea.hbm %s570_s25, 4096 }
  0x15   : > { %p394_p0 = scmp.ne.s32.totalorder %s570_s25, %s393_s30  ;;  %p395_p1 = pneg %p574_p13 }
  0x16   : > { %s398_s4 = scalar_lea.hbm %s810_s0, 8192  ;;  %p399_p4 = scmp.lt.u32.totalorder %s570_s25, %s810_s0 }
  0x17   : > { %p396_p2 = pnand %p395_p1, %p394_p0  ;;  %p400_p5 = scmp.lt.u32.totalorder %s398_s4, %s393_s30 }
  0x18   : > { %p402_p8 = scmp.lt.u32.totalorder %s393_s30, %s570_s25 }
  0x19   : > { %p397_p3 = pneg %p396_p2  ;;  %p401_p7 = por %p400_p5, %p399_p4 }
  0x1b   : > { %p403_p10 = por %p402_p8, %p401_p7 }
  0x1d   : > { %p404_p9 = pnand %p403_p10, %p397_p3 }
  0x1f   : > { %407 = shalt.err (!%p404_p9)
}
  0x20   : > { %s408_s13 = scalar_lea.vmem %s578_s27, 4096  ;;  %s491_s14 = smov [#allocation2]  }
  0x21   : > { %p409_p0 = scmp.ne.s32.totalorder %s578_s27, %s408_s13  ;;  %s413_s16 = sshll.u32 %s491_s14, 4  ;;  %s414_s16 = int_to_ptr.vmem [resolvable:$false] %s413_s16 }
  0x22   : > { %s415_s20 = scalar_lea.vmem %s414_s16, 8192  ;;  %p416_p11 = scmp.lt.s32.totalorder %s578_s27, %s414_s16 }
  0x23   : > { %p411_p2 = pnand %p409_p0, %p395_p1  ;;  %p417_p4 = scmp.lt.s32.totalorder %s415_s20, %s408_s13 }
  0x25   : > { %p412_p12 = pneg %p411_p2  ;;  %p418_p5 = por %p417_p4, %p416_p11 }
  0x27   : > { %p419_p7 = pnand %p418_p5, %p412_p12 }
  0x29   : > { %422 = shalt.err (!%p419_p7)
}
  0x2a   : > { %s492_s21 = smov 128   ;;  %s493_s22 = smov 8  }
  0x2b   : > { %350 = dma.hbm_to_vmem [thread:$0]  (!%p574_p13), %s570_s25, 4096, %s578_s27, %s580_s29, %s492_s21, %s492_s21, %s493_s22  }
  0x2c   : > { %p333_p9 = scmp.ge.s32.totalorder %s489_s9, 1  ;;  %p106_p1 = scmp.lt.s32.totalorder %s489_s9, 3 }
  0x2e   : > { %p107_p3 = pnand %p333_p9, %p106_p1 }
  0x2f   : > { %s611_s23 = sand.u32 (!%p107_p3), 1, %s481_s7  }
  0x30   : > { %110 = sbr.rel (%p107_p3) target bundleno = 93 (0x5d), region = 24  ;;  %s334_s24 = sshll.u32 (!%p107_p3), %s611_s23, 8 }
  0x31   : > { %s113_s26 = scalar_lea.sflag (!%p107_p3), [#allocation3], %s611_s23  ;;  %s615_s30 = scalar_lea.vmem (!%p107_p3), [#allocation2], %s334_s24 }
  0x37   : > { %468 = dma.done.wait (%p550_p6), %s113_s26, 4096  }
  0x38   : > { %470 = vsyncadd (%p550_p6), %s113_s26, 4294963200  ;;  %v169_v0 = vlaneseq  ;;  %s342_s25 = sshll.u32 %s528_s10, 12  ;;  %v137_v3 = vld [vmem:[%s615_s30] sm:$0xff]  ;;  %v138_v4 = vld [vmem:[%s615_s30 + $0x8] sm:$0xff]  ;;  %s629_s17 = scalar_lea.vmem [#allocation5], %s334_s24 }
  0x39   : > { %v139_v5 = vld [vmem:[%s615_s30 + $0x10] sm:$0xff]  ;;  %s254_s27 = sshll.u32 %s629_s17, 4  ;;  %v140_v9 = vld [vmem:[%s615_s30 + $0x18] sm:$0xff]  ;;  %v141_v10 = vld [vmem:[%s615_s30 + $0x20] sm:$0xff]  ;;  %s742_s2 = scalar_lea.hbm %s811_s1, %s342_s25  ;;  %s757_s27 = int_to_ptr.vmem [resolvable:$true] %s254_s27 }
  0x3a   : > { %v170_v1 = vand.u32 127, %v169_v0  ;;  %v142_v11 = vld [vmem:[%s615_s30 + $0x28] sm:$0xff]  ;;  %v143_v15 = vld [vmem:[%s615_s30 + $0x30] sm:$0xff]  ;;  %v144_v16 = vld [vmem:[%s615_s30 + $0x38] sm:$0xff]  ;;  %s241_s10 = scalar_lea.sflag [#allocation4], %s611_s23  ;;  %s423_s3 = scalar_lea.vmem %s757_s27, 4096 }
  0x3b   : > { %v145_v17 = vld [vmem:[%s615_s30 + $0x40] sm:$0xff]  ;;  %v146_v21 = vld [vmem:[%s615_s30 + $0x48] sm:$0xff]  ;;  %v147_v22 = vld [vmem:[%s615_s30 + $0x50] sm:$0xff]  ;;  %p424_p6 = scmp.ne.s32.totalorder %s757_s27, %s423_s3  ;;  %p820_p11 = scmp.ne.s32.totalorder %s815_s18, 0 }
  0x3c   : > { %vm171_vm0 = vcmp.ge.s32.totalorder %v170_v1, 32  ;;  %vm172_vm1 = vcmp.lt.s32.totalorder %v170_v1, 96  ;;  %v148_v23 = vld [vmem:[%s615_s30 + $0x58] sm:$0xff]  ;;  %v149_v27 = vld [vmem:[%s615_s30 + $0x60] sm:$0xff]  ;;  %v150_v28 = vld [vmem:[%s615_s30 + $0x68] sm:$0xff]  ;;  %s494_s4 = smov [#allocation5]  }
  0x3d   : > { %vm621_vm2 = vmand %vm171_vm0, %vm172_vm1  ;;  %v151_v29 = vld [vmem:[%s615_s30 + $0x70] sm:$0xff]  ;;  %v152_v33 = vld [vmem:[%s615_s30 + $0x78] sm:$0xff]  ;;  %p425_p12 = pnand %p424_p6, %p820_p11  ;;  %s427_s5 = sshll.u32 %s494_s4, 4  ;;  %s428_s5 = int_to_ptr.vmem [resolvable:$false] %s427_s5 }
  0x3e   : > { %v176_v6 = vsel %vm621_vm2, %v137_v3, 0.0  ;;  %v177_v7 = vsel %vm621_vm2, %v138_v4, 0.0  ;;  %v178_v8 = vsel %vm621_vm2, %v139_v5, 0.0  ;;  %v179_v12 = vsel %vm621_vm2, %v140_v9, 0.0  ;;  %v153_v34 = vld [vmem:[%s615_s30 + $0x80] sm:$0xff]  ;;  %v154_v35 = vld [vmem:[%s615_s30 + $0x88] sm:$0xff]  ;;  %p430_p8 = scmp.lt.s32.totalorder %s757_s27, %s428_s5 }
  0x3f   : > { %208 = vst [vmem:[%s629_s17] sm:$0xff] %v176_v6  ;;  %209 = vst [vmem:[%s629_s17 + $0x8] sm:$0xff] %v177_v7  ;;  %v180_v13 = vsel %vm621_vm2, %v141_v10, 0.0  ;;  %v181_v14 = vsel %vm621_vm2, %v142_v11, 0.0  ;;  %v182_v18 = vsel %vm621_vm2, %v143_v15, 0.0  ;;  %v183_v19 = vsel %vm621_vm2, %v144_v16, 0.0  ;;  %v155_v39 = vld [vmem:[%s615_s30 + $0x90] sm:$0xff]  ;;  %p426_p13 = pneg %p425_p12 }
  0x40   : > { %210 = vst [vmem:[%s629_s17 + $0x10] sm:$0xff] %v178_v8  ;;  %211 = vst [vmem:[%s629_s17 + $0x18] sm:$0xff] %v179_v12  ;;  %v184_v20 = vsel %vm621_vm2, %v145_v17, 0.0  ;;  %v185_v24 = vsel %vm621_vm2, %v146_v21, 0.0  ;;  %v186_v25 = vsel %vm621_vm2, %v147_v22, 0.0  ;;  %v187_v26 = vsel %vm621_vm2, %v148_v23, 0.0 }
  0x41   : > { %212 = vst [vmem:[%s629_s17 + $0x20] sm:$0xff] %v180_v13  ;;  %213 = vst [vmem:[%s629_s17 + $0x28] sm:$0xff] %v181_v14  ;;  %v188_v30 = vsel %vm621_vm2, %v149_v27, 0.0  ;;  %v189_v31 = vsel %vm621_vm2, %v150_v28, 0.0  ;;  %v190_v32 = vsel %vm621_vm2, %v151_v29, 0.0  ;;  %v191_v36 = vsel %vm621_vm2, %v152_v33, 0.0 }
  0x42   : > { %214 = vst [vmem:[%s629_s17 + $0x30] sm:$0xff] %v182_v18  ;;  %215 = vst [vmem:[%s629_s17 + $0x38] sm:$0xff] %v183_v19  ;;  %v192_v37 = vsel %vm621_vm2, %v153_v34, 0.0  ;;  %v193_v38 = vsel %vm621_vm2, %v154_v35, 0.0  ;;  %v156_v40 = vld [vmem:[%s615_s30 + $0x98] sm:$0xff]  ;;  %v157_v41 = vld [vmem:[%s615_s30 + $0xa0] sm:$0xff] }
  0x43   : > { %216 = vst [vmem:[%s629_s17 + $0x40] sm:$0xff] %v184_v20  ;;  %217 = vst [vmem:[%s629_s17 + $0x48] sm:$0xff] %v185_v24  ;;  %v194_v42 = vsel %vm621_vm2, %v155_v39, 0.0  ;;  %v195_v43 = vsel %vm621_vm2, %v156_v40, 0.0  ;;  %v196_v44 = vsel %vm621_vm2, %v157_v41, 0.0  ;;  %v158_v45 = vld [vmem:[%s615_s30 + $0xa8] sm:$0xff] }
  0x44   : > { %218 = vst [vmem:[%s629_s17 + $0x50] sm:$0xff] %v186_v25  ;;  %219 = vst [vmem:[%s629_s17 + $0x58] sm:$0xff] %v187_v26  ;;  %v159_v46 = vld [vmem:[%s615_s30 + $0xb0] sm:$0xff]  ;;  %v160_v47 = vld [vmem:[%s615_s30 + $0xb8] sm:$0xff]  ;;  %v197_v48 = vsel %vm621_vm2, %v158_v45, 0.0  ;;  %s429_s11 = scalar_lea.vmem %s428_s5, 8192 }
  0x45   : > { %220 = vst [vmem:[%s629_s17 + $0x60] sm:$0xff] %v188_v30  ;;  %221 = vst [vmem:[%s629_s17 + $0x68] sm:$0xff] %v189_v31  ;;  %v198_v49 = vsel %vm621_vm2, %v159_v46, 0.0  ;;  %v199_v50 = vsel %vm621_vm2, %v160_v47, 0.0  ;;  %v161_v51 = vld [vmem:[%s615_s30 + $0xc0] sm:$0xff]  ;;  %v162_v52 = vld [vmem:[%s615_s30 + $0xc8] sm:$0xff]  ;;  %p431_p10 = scmp.lt.s32.totalorder %s429_s11, %s423_s3 }
  0x46   : > { %222 = vst [vmem:[%s629_s17 + $0x70] sm:$0xff] %v190_v32  ;;  %223 = vst [vmem:[%s629_s17 + $0x78] sm:$0xff] %v191_v36  ;;  %v163_v53 = vld [vmem:[%s615_s30 + $0xd0] sm:$0xff]  ;;  %v200_v54 = vsel %vm621_vm2, %v161_v51, 0.0  ;;  %v201_v55 = vsel %vm621_vm2, %v162_v52, 0.0  ;;  %v164_v57 = vld [vmem:[%s615_s30 + $0xd8] sm:$0xff] }
  0x47   : > { %224 = vst [vmem:[%s629_s17 + $0x80] sm:$0xff] %v192_v37  ;;  %225 = vst [vmem:[%s629_s17 + $0x88] sm:$0xff] %v193_v38  ;;  %v202_v56 = vsel %vm621_vm2, %v163_v53, 0.0  ;;  %v165_v58 = vld [vmem:[%s615_s30 + $0xe0] sm:$0xff]  ;;  %v166_v59 = vld [vmem:[%s615_s30 + $0xe8] sm:$0xff]  ;;  %v203_v60 = vsel %vm621_vm2, %v164_v57, 0.0  ;;  %p432_p0 = por %p431_p10, %p430_p8 }
  0x48   : > { %226 = vst [vmem:[%s629_s17 + $0x90] sm:$0xff] %v194_v42  ;;  %227 = vst [vmem:[%s629_s17 + $0x98] sm:$0xff] %v195_v43  ;;  %v204_v61 = vsel %vm621_vm2, %v165_v58, 0.0  ;;  %v205_v62 = vsel %vm621_vm2, %v166_v59, 0.0  ;;  %v167_v63 = vld [vmem:[%s615_s30 + $0xf0] sm:$0xff]  ;;  %v168_v0 = vld [vmem:[%s615_s30 + $0xf8] sm:$0xff] }
  0x49   : > { %228 = vst [vmem:[%s629_s17 + $0xa0] sm:$0xff] %v196_v44  ;;  %229 = vst [vmem:[%s629_s17 + $0xa8] sm:$0xff] %v197_v48  ;;  %v206_v1 = vsel %vm621_vm2, %v167_v63, 0.0  ;;  %v207_v3 = vsel %vm621_vm2, %v168_v0, 0.0  ;;  %p433_p2 = pnand %p432_p0, %p426_p13 }
  0x4a   : > { %230 = vst [vmem:[%s629_s17 + $0xb0] sm:$0xff] %v198_v49  ;;  %231 = vst [vmem:[%s629_s17 + $0xb8] sm:$0xff] %v199_v50 }
  0x4b   : > { %232 = vst [vmem:[%s629_s17 + $0xc0] sm:$0xff] %v200_v54  ;;  %233 = vst [vmem:[%s629_s17 + $0xc8] sm:$0xff] %v201_v55 }
  0x4c   : > { %234 = vst [vmem:[%s629_s17 + $0xd0] sm:$0xff] %v202_v56  ;;  %235 = vst [vmem:[%s629_s17 + $0xd8] sm:$0xff] %v203_v60 }
  0x4d   : > { %236 = vst [vmem:[%s629_s17 + $0xe0] sm:$0xff] %v204_v61  ;;  %237 = vst [vmem:[%s629_s17 + $0xe8] sm:$0xff] %v205_v62 }
  0x4e   : > { %238 = vst [vmem:[%s629_s17 + $0xf0] sm:$0xff] %v206_v1  ;;  %239 = vst [vmem:[%s629_s17 + $0xf8] sm:$0xff] %v207_v3 }
  0x4f   : > { %436 = shalt.err (!%p433_p2)
}
  0x50   : > { %s437_s13 = scalar_lea.hbm %s742_s2, 4096  ;;  %s441_s20 = scalar_lea.hbm %s811_s1, 8192 }
  0x51   : > { %p438_p4 = scmp.ne.s32.totalorder %s742_s2, %s437_s13  ;;  %p442_p9 = scmp.lt.u32.totalorder %s742_s2, %s811_s1 }
  0x52   : > { %p443_p1 = scmp.lt.u32.totalorder %s441_s20, %s437_s13  ;;  %p445_p6 = scmp.lt.u32.totalorder %s437_s13, %s742_s2 }
  0x53   : > { %p439_p5 = pnand %p438_p4, %p820_p11 }
  0x54   : > { %p444_p3 = por %p443_p1, %p442_p9 }
  0x55   : > { %p440_p7 = pneg %p439_p5 }
  0x56   : > { %p446_p12 = por %p445_p6, %p444_p3 }
  0x58   : > { %p447_p13 = pnand %p446_p12, %p440_p7 }
  0x5a   : > { %450 = shalt.err (!%p447_p13)
}
  0x5b   : > { %s495_s24 = smov 128   ;;  %s496_s26 = smov 8  }
  0x5c   : > { %345 = dma.vmem_to_hbm [thread:$0]  (%p820_p11), %s757_s27, 4096, %s742_s2, %s241_s10, %s495_s24, %s495_s24, %s496_s26  }
  0x5d PF: > { %s269_s30 = sand.u32 1, %s477_s6   ;;  %p821_p8 = scmp.ne.s32.totalorder %s816_s19, 0 }
  0x5e   : > { %p822_p10 = scmp.ge.s32.totalorder %s489_s9, 2  ;;  %s270_s25 = scalar_lea.sflag [#allocation4], %s269_s30 }
  0x60   : > { %p352_p0 = pnand %p822_p10, %p821_p8 }
  0x62   : > { %472 = dma.done.wait (!%p352_p0), %s270_s25, 4096  }
  0x63   : > { %474 = vsyncadd (!%p352_p0), %s270_s25, 4294963200  ;;  %p14_p2 = scmp.ge.s32.totalorder %s532_s12, 4   ;;  %s823_s6 = smov %s481_s7 }
  0x64   : > { %s824_s7 = smov %s485_s8  ;;  %s825_s8 = smov %s544_s15 }
  0x65   : > { %s826_s9 = smov %s532_s12  ;;  %16 = sbr.rel (!%p14_p2) target bundleno = 5 (0x5), region = 69 }
  0x6c   :  { %275 = vsyncpa [#allocation3], 1 }
  0x6d   :  { %277 = vsyncpa [#allocation3 + $0x1], 1 }
  0x6e   :  { %278 = vsyncpa [#allocation4], 1 }
  0x6f   :  { %280 = vsyncpa [#allocation4 + $0x1], 1 }

</bundles_post_ra>
